<compile_context>
chip_gen: v6e
topology: v6e:2x2x1
jax: 0.10.0
libtpu: 0.0.40
codegen_flags: <defaults>
</compile_context>

<pallas_src>
import functools

import jax
import jax.numpy as jnp
from jax.experimental import pallas as pl
from jax.experimental.pallas import tpu as pltpu


def _round_up(x, m):
    return ((x + m - 1) // m) * m


def _vmem_limit_bytes():
    # Generation-aware VMEM budget: ~3/4 of physical, capped at 100 MiB.
    # v7x: 64 MiB physical -> 48 MiB; v5e/v6e: 128 MiB -> 96 MiB.
    try:
        cap = pltpu.get_tpu_info().vmem_capacity_bytes
    except Exception:
        cap = 64 * 1024 * 1024  # conservative fallback (v7x-sized)
    return min((cap * 3) // 4, 100 * 1024 * 1024)


def _rel_emb_kernel(ids_ref, tbl_ref, gamma_ref, beta_ref, o_ref, *, true_d):
    """One-hot gather of the Linear-folded table + LeakyReLU(0.1) + LayerNorm.

    ids_ref   : (TILE, 1)      int32    relation ids for this row tile
    tbl_ref   : (R_pad, D_pad) bf16     emb @ W^T + b, zero-padded, grid-resident
    gamma_ref : (1, D_pad)     f32      LayerNorm scale (zero-padded)
    beta_ref  : (1, D_pad)     f32      LayerNorm shift (zero-padded)
    o_ref     : (TILE, D_pad)  f32/bf16 output tile (lane-dense store)
    """
    tile = ids_ref.shape[0]
    r_pad, d_pad = tbl_ref.shape

    # Embedding(+Linear) gather as a one-hot matmul on the MXU: exact row
    # selection of the tiny VMEM-resident bf16 table.
    # TODO(synk): for large R_pad (>~512) replace the one-hot matmul with a
    # scalar-prefetch / pl.Element row gather (contraction depth collapses MXU
    # utilization as R grows).
    ids = ids_ref[...]                                               # (TILE, 1) i32
    rel_iota = jax.lax.broadcasted_iota(jnp.int32, (tile, r_pad), 1)
    onehot = (ids == rel_iota).astype(jnp.bfloat16)                  # (TILE, R_pad)
    h = jnp.dot(onehot, tbl_ref[...], preferred_element_type=jnp.float32)

    # LeakyReLU(negative_slope=0.1); elementwise math in f32 (v5e has no bf16 VPU/EUP).
    h = jnp.where(h > 0, h, 0.1 * h)

    # Dropout: identity in eval mode.
    # TODO(synk): training-mode dropout would use pltpu.prng_seed / prng_random_bits.

    # LayerNorm over the TRUE feature dim only.  Padded lanes hold zeros, so
    # they do not perturb the sum; they are masked out of the variance.
    inv_d = 1.0 / true_d
    mean = jnp.sum(h, axis=-1, keepdims=True) * inv_d
    cent = h - mean
    if d_pad != true_d:
        lane = jax.lax.broadcasted_iota(jnp.int32, (tile, d_pad), 1)
        cent = jnp.where(lane < true_d, cent, 0.0)
    var = jnp.sum(cent * cent, axis=-1, keepdims=True) * inv_d
    normed = cent * jax.lax.rsqrt(var + 1e-5)
    # gamma/beta are zero-padded, so padded output lanes are exactly 0.
    o_ref[...] = (normed * gamma_ref[...] + beta_ref[...]).astype(o_ref.dtype)


def prepare_kernel_params(params):
    """One-time folding / padding so the per-call forward path is a single kernel.

    Folds the Linear layer into the embedding table in f32:
        proj_table[r] = emb[r] @ W^T + b
    and zero-pads the feature dim to a multiple of 128 for lane-dense vregs and
    stores.  LayerNorm gamma/beta are zero-padded so padded output lanes are 0.
    """
    emb_w = params["emb_weight"].astype(jnp.float32)                 # (R, D)
    R, D = emb_w.shape
    proj = (emb_w @ params["lin_weight"].astype(jnp.float32).T
            + params["lin_bias"].astype(jnp.float32))                # (R, D) f32
    # TODO(synk): eval-mode only -> LeakyReLU+LayerNorm could also be folded
    # here, turning the kernel into a pure table gather.

    R_pad = _round_up(max(R, 8), 8)      # sublane-align the table rows
    D_pad = _round_up(D, 128)            # lane-align the feature dim
    table = jnp.zeros((R_pad, D_pad), jnp.float32).at[:R, :D].set(proj)
    gamma = jnp.zeros((1, D_pad), jnp.float32).at[0, :D].set(
        params["ln_gamma"].astype(jnp.float32))
    beta = jnp.zeros((1, D_pad), jnp.float32).at[0, :D].set(
        params["ln_beta"].astype(jnp.float32))
    return dict(
        table=table.astype(jnp.bfloat16),   # bf16 MXU operand for the one-hot gather
        gamma=gamma,
        beta=beta,
        emb_dim=D,
    )


def relation_embedding_forward(rel_ids, kparams, *, row_tile=512,
                               out_dtype=jnp.float32,
                               single_buffer_invariants=False):
    """rel_ids: int array of arbitrary leading shape. Returns (..., emb_dim)."""
    table = kparams["table"]
    R_pad, D_pad = table.shape
    D = kparams["emb_dim"]

    lead_shape = rel_ids.shape
    flat_ids = rel_ids.reshape(-1).astype(jnp.int32)
    N = flat_ids.shape[0]
    ids2d = flat_ids.reshape(N, 1)

    # Row tile: large tiles amortize the ~0.35us per-grid-step overhead, but cap
    # so moderate N still yields >= 2 blocks (work for both v7x TensorCores).
    tile = _round_up(min(row_tile, max(N, 8)), 8)
    if N > 256:
        tile = min(tile, _round_up(pl.cdiv(N, 2), 8))
    n_blocks = pl.cdiv(N, tile)   # ragged last block is clipped by Pallas

    # Grid-invariant operands: constant index_map (never re-fetched).  They are
    # only a few KiB after the Linear fold, so double-buffering costs nothing at
    # demo sizes; enable single-buffering for large D/R on v7x (64 MiB VMEM).
    def const_spec(shape):
        if single_buffer_invariants:
            return pl.BlockSpec(shape, lambda i: (0, 0),
                                pipeline_mode=pl.Buffered(1))
        return pl.BlockSpec(shape, lambda i: (0, 0))

    out = pl.pallas_call(
        functools.partial(_rel_emb_kernel, true_d=D),
        out_shape=jax.ShapeDtypeStruct((N, D_pad), out_dtype),
        grid_spec=pltpu.PrefetchScalarGridSpec(
            num_scalar_prefetch=0,
            grid=(n_blocks,),
            in_specs=[
                pl.BlockSpec((tile, 1), lambda i: (i, 0)),   # ids tile
                const_spec((R_pad, D_pad)),                  # folded table (resident)
                const_spec((1, D_pad)),                      # LN gamma
                const_spec((1, D_pad)),                      # LN beta
            ],
            out_specs=pl.BlockSpec((tile, D_pad), lambda i: (i, 0)),
        ),
        compiler_params=pltpu.CompilerParams(
            dimension_semantics=("parallel",),   # shard row tiles across v7x's 2 TCs
            vmem_limit_bytes=_vmem_limit_bytes(),
        ),
    )(ids2d, table, kparams["gamma"], kparams["beta"])

    if D_pad != D:
        # Kernel output is lane-dense; trim the zero-padded lanes.  When emb_dim
        # is already a multiple of 128 there is no padding and no trim.
        out = out[:, :D]
    return out.reshape(*lead_shape, D)


def init_params(key, num_rels, emb_dim):
    k_emb, k_w, k_b = jax.random.split(key, 3)

    # nn.init.xavier_uniform_ on embedding weight.
    fan_in, fan_out = num_rels + 1, emb_dim
    a = (6.0 / (fan_in + fan_out)) ** 0.5
    emb_weight = jax.random.uniform(
        k_emb, (num_rels + 1, emb_dim), jnp.float32, minval=-a, maxval=a)

    # nn.Linear default init bound = 1/sqrt(in_features).
    bound = 1.0 / (emb_dim ** 0.5)
    lin_weight = jax.random.uniform(
        k_w, (emb_dim, emb_dim), jnp.float32, minval=-bound, maxval=bound)
    lin_bias = jax.random.uniform(
        k_b, (emb_dim,), jnp.float32, minval=-bound, maxval=bound)

    ln_gamma = jnp.ones((emb_dim,), jnp.float32)
    ln_beta = jnp.zeros((emb_dim,), jnp.float32)

    return dict(emb_weight=emb_weight, lin_weight=lin_weight, lin_bias=lin_bias,
                ln_gamma=ln_gamma, ln_beta=ln_beta)


def reference_forward(rel_ids, params):
    """Pure-JAX f32 reference for correctness check (matches the PyTorch module)."""
    x = jnp.take(params["emb_weight"], rel_ids, axis=0)
    h = x @ params["lin_weight"].T + params["lin_bias"]
    h = jnp.where(h > 0, h, 0.1 * h)
    mean = jnp.mean(h, axis=-1, keepdims=True)
    var = jnp.mean((h - mean) ** 2, axis=-1, keepdims=True)
    h = (h - mean) / jnp.sqrt(var + 1e-5)
    return h * params["ln_gamma"] + params["ln_beta"]


if __name__ == "__main__":
    key = jax.random.PRNGKey(0)
    num_rels = 10
    emb_dim = 32
    batch, seq = 2, 8

    params = init_params(key, num_rels, emb_dim)
    kparams = prepare_kernel_params(params)

    k_ids = jax.random.fold_in(key, 42)
    rel_ids = jax.random.randint(k_ids, (batch, seq), 0, num_rels + 1, dtype=jnp.int32)

    out = relation_embedding_forward(rel_ids, kparams)
    out = jax.block_until_ready(out)

    ref = reference_forward(rel_ids, params)
    assert out.shape == (batch, seq, emb_dim), out.shape
    # The projection is folded in f32; the only quantization left is the bf16
    # cast of the folded table, so tolerance can be tighter than before.
    max_err = float(jnp.max(jnp.abs(out - ref)))
    assert jnp.allclose(out, ref, atol=2e-2, rtol=2e-2), max_err

    print("KERNEL_OK")
</pallas_src>

<mosaic_0001>
module attributes {stable_mosaic.version = 11 : i64} {
  func.func @_rel_emb_kernel(%arg0: i32, %arg1: memref<16x1xi32, #tpu.memory_space<vmem>>, %arg2: memref<16x128xbf16, #tpu.memory_space<vmem>>, %arg3: memref<1x128xf32, #tpu.memory_space<vmem>>, %arg4: memref<1x128xf32, #tpu.memory_space<vmem>>, %arg5: memref<16x128xf32, #tpu.memory_space<vmem>>) attributes {dimension_semantics = [#tpu.dimension_semantics<parallel>], iteration_bounds = array<i64: 1>, scalar_prefetch = 0 : i64, scratch_operands = 0 : i64, tpu.core_type = #tpu.core_type<tc>, window_params = [{transform_indices = @transform_0, window_bounds = array<i64: 16, 1>}, {pipeline_mode = #tpu.pipeline_mode<synchronous>, transform_indices = @transform_1, window_bounds = array<i64: 16, 128>}, {pipeline_mode = #tpu.pipeline_mode<synchronous>, transform_indices = @transform_2, window_bounds = array<i64: 1, 128>}, {pipeline_mode = #tpu.pipeline_mode<synchronous>, transform_indices = @transform_3, window_bounds = array<i64: 1, 128>}, {transform_indices = @transform_4, window_bounds = array<i64: 16, 128>}]} {
    %c0 = arith.constant 0 : index
    %c0_0 = arith.constant 0 : index
    %0 = vector.load %arg1[%c0, %c0_0] : memref<16x1xi32, #tpu.memory_space<vmem>>, vector<16x1xi32>
    %1 = tpu.iota {dimensions = array<i32: 1>} : vector<16x16xi32>
    %2 = vector.broadcast %0 : vector<16x1xi32> to vector<16x16xi32>
    %3 = arith.cmpi eq, %2, %1 : vector<16x16xi32>
    %4 = arith.extui %3 : vector<16x16xi1> to vector<16x16xi32>
    %5 = arith.sitofp %4 : vector<16x16xi32> to vector<16x16xf32>
    %6 = arith.truncf %5 : vector<16x16xf32> to vector<16x16xbf16>
    %c0_1 = arith.constant 0 : index
    %c0_2 = arith.constant 0 : index
    %7 = vector.load %arg2[%c0_1, %c0_2] : memref<16x128xbf16, #tpu.memory_space<vmem>>, vector<16x128xbf16>
    %cst = arith.constant dense<0.000000e+00> : vector<16x128xf32>
    %8 = tpu.matmul %6, %7, %cst {dimension_numbers = #tpu.dot_dimension_numbers<[1], [0], [0], [1], [0, 0, 1, 1], [], []>} : vector<16x16xbf16>, vector<16x128xbf16>, vector<16x128xf32> -> vector<16x128xf32>
    %cst_3 = arith.constant 0.000000e+00 : f32
    %9 = vector.broadcast %cst_3 : f32 to vector<16x128xf32>
    %10 = arith.cmpf ogt, %8, %9 : vector<16x128xf32>
    %cst_4 = arith.constant 1.000000e-01 : f32
    %11 = vector.broadcast %cst_4 : f32 to vector<16x128xf32>
    %12 = arith.mulf %11, %8 : vector<16x128xf32>
    %13 = arith.select %10, %8, %12 : vector<16x128xi1>, vector<16x128xf32>
    %cst_5 = arith.constant dense<0.000000e+00> : vector<16xf32>
    %14 = vector.multi_reduction <add>, %13, %cst_5 [1] : vector<16x128xf32> to vector<16xf32>
    %15 = vector.shape_cast %14 : vector<16xf32> to vector<16x1xf32>
    %cst_6 = arith.constant 3.125000e-02 : f32
    %16 = vector.broadcast %cst_6 : f32 to vector<16x1xf32>
    %17 = arith.mulf %15, %16 : vector<16x1xf32>
    %18 = vector.broadcast %17 : vector<16x1xf32> to vector<16x128xf32>
    %19 = arith.subf %13, %18 : vector<16x128xf32>
    %20 = tpu.iota {dimensions = array<i32: 1>} : vector<16x128xi32>
    %c32_i32 = arith.constant 32 : i32
    %21 = vector.broadcast %c32_i32 : i32 to vector<16x128xi32>
    %22 = arith.cmpi slt, %20, %21 : vector<16x128xi32>
    %cst_7 = arith.constant 0.000000e+00 : f32
    %23 = vector.broadcast %cst_7 : f32 to vector<16x128xf32>
    %24 = arith.select %22, %19, %23 : vector<16x128xi1>, vector<16x128xf32>
    %25 = arith.mulf %24, %24 : vector<16x128xf32>
    %cst_8 = arith.constant dense<0.000000e+00> : vector<16xf32>
    %26 = vector.multi_reduction <add>, %25, %cst_8 [1] : vector<16x128xf32> to vector<16xf32>
    %27 = vector.shape_cast %26 : vector<16xf32> to vector<16x1xf32>
    %cst_9 = arith.constant 3.125000e-02 : f32
    %28 = vector.broadcast %cst_9 : f32 to vector<16x1xf32>
    %29 = arith.mulf %27, %28 : vector<16x1xf32>
    %cst_10 = arith.constant 9.99999974E-6 : f32
    %30 = vector.broadcast %cst_10 : f32 to vector<16x1xf32>
    %31 = arith.addf %29, %30 : vector<16x1xf32>
    %32 = math.rsqrt %31 : vector<16x1xf32>
    %33 = vector.broadcast %32 : vector<16x1xf32> to vector<16x128xf32>
    %34 = arith.mulf %24, %33 : vector<16x128xf32>
    %c0_11 = arith.constant 0 : index
    %c0_12 = arith.constant 0 : index
    %35 = vector.load %arg3[%c0_11, %c0_12] : memref<1x128xf32, #tpu.memory_space<vmem>>, vector<1x128xf32>
    %36 = vector.broadcast %35 : vector<1x128xf32> to vector<16x128xf32>
    %37 = arith.mulf %34, %36 : vector<16x128xf32>
    %c0_13 = arith.constant 0 : index
    %c0_14 = arith.constant 0 : index
    %38 = vector.load %arg4[%c0_13, %c0_14] : memref<1x128xf32, #tpu.memory_space<vmem>>, vector<1x128xf32>
    %39 = vector.broadcast %38 : vector<1x128xf32> to vector<16x128xf32>
    %40 = arith.addf %37, %39 : vector<16x128xf32>
    %c0_15 = arith.constant 0 : index
    %c0_16 = arith.constant 0 : index
    %41 = vector.load %arg5[%c0_15, %c0_16] : memref<16x128xf32, #tpu.memory_space<vmem>>, vector<16x128xf32>
    tpu.vector_store %arg5[%c0_15, %c0_16], %40 {strides = array<i32>} : memref<16x128xf32, #tpu.memory_space<vmem>>, vector<16x128xf32>,
    return
  }
  func.func @transform_0(%arg0: i32) -> (i32, i32) {
    %c0_i32 = arith.constant 0 : i32
    %c0_i32_0 = arith.constant 0 : i32
    return %arg0, %c0_i32 : i32, i32
  }
  func.func @transform_1(%arg0: i32) -> (i32, i32) {
    %c0_i32 = arith.constant 0 : i32
    %c0_i32_0 = arith.constant 0 : i32
    %c0_i32_1 = arith.constant 0 : i32
    return %c0_i32, %c0_i32_0 : i32, i32
  }
  func.func @transform_2(%arg0: i32) -> (i32, i32) {
    %c0_i32 = arith.constant 0 : i32
    %c0_i32_0 = arith.constant 0 : i32
    %c0_i32_1 = arith.constant 0 : i32
    return %c0_i32, %c0_i32_0 : i32, i32
  }
  func.func @transform_3(%arg0: i32) -> (i32, i32) {
    %c0_i32 = arith.constant 0 : i32
    %c0_i32_0 = arith.constant 0 : i32
    %c0_i32_1 = arith.constant 0 : i32
    return %c0_i32, %c0_i32_0 : i32, i32
  }
  func.func @transform_4(%arg0: i32) -> (i32, i32) {
    %c0_i32 = arith.constant 0 : i32
    %c0_i32_0 = arith.constant 0 : i32
    return %arg0, %c0_i32 : i32, i32
  }
}

</mosaic_0001>

<bundles_post_ra>
// kernel: tpu_custom_call.1
= control target key start
LH: loop header
LB: loop body
LE: loop exit
PB: predicated region body
PF: predicated region fallthrough
CT: control target
= control target key end

     0   :  { %v204_v1 = vmov 0   ;;  %v205_v2 = vmov 0.0   ;;  %s253_s0 = inlined_call_operand.vmem [shape: s32[16,1], index: 0, kind: input, shape index: {}]   ;;  %s254_s1 = inlined_call_operand.vmem [shape: bf16[16,128], index: 1, kind: input, shape index: {}]   ;;  %s255_s2 = inlined_call_operand.vmem [shape: f32[1,128], index: 2, kind: input, shape index: {}]   ;;  %s256_s3 = inlined_call_operand.vmem [shape: f32[1,128], index: 3, kind: input, shape index: {}]   ;;  %s257_s4 = inlined_call_operand.hbm [shape: f32[16,128], index: 4, kind: output, shape index: {}]  }
   0x1   :  { %v19_v0 = vld [vmem:[%s253_s0] sm:$0xff]  ;;  %176 = vset.pattern.permute.xlu0 %v204_v1  ;;  %164 = vmatprep.subr.bf16.mxu0 %v205_v2 }
   0x2   :  { %v177_v3 = vld [vmem:[%s254_s1] sm:$0xff]  }
   0x3   :  { %9 = vsyncpa [#allocation3], 0  ;;  %24 = vperm.xlu0 %176, %v19_v0   ;;  %v20_v4 = vld [vmem:[%s253_s0 + $0x8] sm:$0xff]  ;;  %165 = vmatpush3.bf16.msra.mxu0 %v177_v3  ;;  %vm206_vm0 = vmmov 0   ;;  %v21_v5 = vlaneseq  ;;  %vm44_vm3 = vcmask 130048   ;;  %s207_s23 = smov [#allocation2]  }
   0x4   :  { %166 = vmatprep.mubr.msk.bf16.mxu0 %vm206_vm0, %v205_v2  ;;  %v160_v37 = vld [vmem:[%s255_s2] ss:$0 sm:$0xff]  ;;  %s145_s24 = sshll.u32 %s207_s23, 4  ;;  %s146_s24 = int_to_ptr.vmem [resolvable:$true] %s145_s24 }
   0x5   :  { %v22_v6 = vand.u32 127, %v21_v5  ;;  %v161_v39 = vld [vmem:[%s256_s3] ss:$0 sm:$0xff]  ;;  %s182_s25 = scalar_lea.vmem %s146_s24, 256  ;;  %p187_p1 = scmp.lt.s32.totalorder %s146_s24, %s146_s24 }
   0x6   :  { %p183_p0 = scmp.ne.s32.totalorder %s146_s24, %s182_s25  ;;  %p188_p2 = scmp.lt.s32.totalorder %s182_s25, %s182_s25 }
   0x7   :  { %27 = vperm.xlu0 %176, %v20_v4   ;;  %vm103_vm6 = vcmp.lt.s32.totalorder %v22_v6, 32 }
   0x8   :  { %p189_p3 = por %p188_p2, %p187_p1 }
   0xa   :  { %p190_p4 = pnand %p189_p3, %p183_p0 }
  0x7e   :  { %v25_v7 = vpop.permute.xlu0 %24 }
  0x7f   :  { %vm29_vm1 = vcmp.eq.s32.totalorder %v25_v7, %v22_v6 }
  0x80   :  { %v156_v9 = vsel %vm29_vm1, 1.0, %v205_v2 }
  0x82   :  { %v28_v8 = vpop.permute.xlu0 %27 }
  0x83   :  { %vm30_vm2 = vcmp.eq.s32.totalorder %v28_v8, %v22_v6 }
  0x84   :  { %v157_v10 = vsel %vm30_vm2, 1.0, %v205_v2 }
  0x85   :  { %v35_v11 = vpack.c.bf16 %v157_v10, %v156_v9 }
  0x87   :  { %167 = vmatmul.mubr.msk.bf16.vlgmr.msra.gmra.mxu0 %vm44_vm3, %v35_v11 }
 0x147   :  { %v82_v12 = vpop.f32.mrf.mxu0 }
 0x148   :  { %v91_v13 = vmul.f32 0.1, %v82_v12  ;;  %vm89_vm4 = vcmp.gt.f32.partialorder %v82_v12, 0.0 }
 0x149   :  { %v168_v14 = vpop.f32.mrf.mxu0 }
 0x14a   :  { %v93_v15 = vsel %vm89_vm4, %v82_v12, %v91_v13 }
 0x14b   :  { %95 = vadd.xlane.f32.xlu1 %v93_v15  ;;  %v85_v16 = vpop.f32.mrf.mxu0 }
 0x14c   :  { %v92_v17 = vmul.f32 0.1, %v85_v16  ;;  %vm90_vm5 = vcmp.gt.f32.partialorder %v85_v16, 0.0 }
 0x14d   :  { %v169_v18 = vpop.f32.mrf.mxu0 }
 0x14e   :  { %v94_v19 = vsel %vm90_vm5, %v85_v16, %v92_v17 }
 0x14f   :  { %97 = vadd.xlane.f32.xlu1 %v94_v19 }
 0x1d4   :  { %v96_v20 = vpop.xlane.xlu1 %95 }
 0x1d5   :  { %v99_v21 = vmul.f32 0.03125, %v96_v20 }
 0x1d7   :  { %v101_v22 = vsub.f32 %v93_v15, %v99_v21 }
 0x1d8   :  { %v98_v23 = vpop.xlane.xlu1 %97 }
 0x1d9   :  { %v100_v24 = vmul.f32 0.03125, %v98_v23  ;;  %v104_v25 = vsel %vm103_vm6, %v101_v22, 0.0 }
 0x1da   :  { %v106_v26 = vmul.f32 %v104_v25, %v104_v25 }
 0x1db   :  { %v102_v27 = vsub.f32 %v94_v19, %v100_v24 }
 0x1dc   :  { %108 = vadd.xlane.f32.xlu0 %v106_v26 }
 0x1dd   :  { %v105_v28 = vsel %vm103_vm6, %v102_v27, 0.0 }
 0x1de   :  { %v107_v29 = vmul.f32 %v105_v28, %v105_v28 }
 0x1e0   :  { %110 = vadd.xlane.f32.xlu1 %v107_v29 }
 0x265   :  { %v109_v30 = vpop.xlane.xlu0 %108 }
 0x266   :  { %v112_v31 = vmul.f32 0.03125, %v109_v30 }
 0x268   :  { %v114_v32 = vadd.f32 1e-05, %v112_v31 }
 0x269   :  { %v111_v33 = vpop.xlane.xlu1 %110 }
 0x26a   :  { %178 = vrsqrt.f32 %v114_v32  ;;  %v113_v34 = vmul.f32 0.03125, %v111_v33 }
 0x26c   :  { %v115_v35 = vadd.f32 1e-05, %v113_v34 }
 0x26e   :  { %180 = vrsqrt.f32 %v115_v35 }
 0x277   :  { %v179_v36 = vpop.eup %178 }
 0x278   :  { %v118_v38 = vmul.f32 %v179_v36, %v104_v25 }
 0x27a   :  { %v127_v40 = vmul.f32 %v160_v37, %v118_v38 }
 0x27b   :  { %v181_v41 = vpop.eup %180 }
 0x27c   :  { %v119_v42 = vmul.f32 %v181_v41, %v105_v28  ;;  %v136_v43 = vadd.f32 %v161_v39, %v127_v40 }
 0x27e   :  { %v128_v44 = vmul.f32 %v160_v37, %v119_v42  ;;  %138 = vst [vmem:[#allocation2] sm:$0xff] %v136_v43 }
 0x280   :  { %v137_v45 = vadd.f32 %v161_v39, %v128_v44 }
 0x282   :  { %139 = vst [vmem:[#allocation2 + $0x8] sm:$0xff] %v137_v45 }
 0x283   :  { %193 = shalt.err (!%p190_p4)
}
 0x284   :  { %s208_s2 = smov 128   ;;  %s209_s3 = smov 8  }
 0x285   :  { %151 = dma.vmem_to_hbm [thread:$0]  %s146_s24, 256, %s257_s4, [#allocation3], %s208_s2, %s208_s2, %s209_s3  }
 0x286   :  { %202 = dma.done.wait [#allocation3], 256  }
 0x287   :  { %203 = vsyncadd [#allocation3], 4294967040 }
 0x288   :  { %155 = vsyncpa [#allocation3], 1 }

</bundles_post_ra>
